<compile_context>
chip_gen: v7x
topology: tpu7x:2x2x1
jax: 0.10.0
libtpu: 0.0.40
codegen_flags: <defaults>
</compile_context>

<pallas_src>
import numpy as np
import jax
import jax.numpy as jnp
from jax import lax
from jax.experimental import pallas as pl
from jax.experimental.pallas import tpu as pltpu


# ----------------------------------------------------------------------------
# Deterministic "parameters" from BaseReconModel.__init__
# ----------------------------------------------------------------------------
FOCAL = 1015.0
IMG_SIZE = 512
HALF_IMG = float(IMG_SIZE // 2)   # 256.0
CAM_Z = 10.0
LANE = 128

ID_INIT = np.array(
    [0.0816002, -0.00200936, 0.00144346, -0.00122638, 3.41109e-06, 0.000488255,
     -0.000264426, 0.000311428, -0.000101785, 7.52266e-05, -8.91395e-05,
     -3.3526e-05, 4.18179e-05, 4.89653e-05, 5.29148e-06, 1.70476e-05,
     3.64553e-05, -1.57865e-05, 2.2001e-07, 1.7283e-05, 3.26759e-05,
     1.42219e-05, 1.05463e-05, -2.50615e-05, 1.27146e-05, 1.56672e-06,
     -8.5737e-06, 2.91094e-05, -1.94864e-05, 4.18188e-06, 1.0258e-05,
     8.23654e-06, 2.98166e-05, 1.68243e-06, 2.10065e-05, 7.28352e-06,
     -6.17266e-06, -2.22083e-06, -1.78076e-05, -1.50372e-05, -8.59465e-07,
     1.5521e-05, -3.57433e-06, -9.40569e-06, 1.3817e-05, 7.26787e-06,
     -1.84304e-05, -4.06662e-06, -1.37241e-06, -1.06965e-05],
    dtype=np.float32).reshape(1, -1)

EXP_INIT = np.array(
    [0.145831, -0.00119506, 0.00248977, -0.00555244, -0.0636425, 0.00551691,
     0.0483311, -0.031428, -0.00887051, 0.0125705, 0.0661306, 0.0104712,
     -0.00596938, -0.00125942, 0.071329, -0.00245361, 0.0310085, 0.00739647,
     0.0184184, 0.00647163, -0.00596638, 0.0110645, 0.0591841, -0.0477235,
     0.0048617, -0.0104558, 0.0108776, 0.0222797, -0.0137854, 0.00955756,
     0.00425438, -0.00370248, -0.0238861, -0.000651003, 0.000525417,
     -0.121418, -0.000577637, -0.0414738, 0.0422691, 0.029649, -0.107663,
     0.02445, 0.0152015, 0.0935797, -0.790362, -0.0118333, -0.536054],
    dtype=np.float32).reshape(1, -1)


def get_p_mat():
    return jnp.array([[FOCAL, 0.0, HALF_IMG],
                      [0.0, FOCAL, HALF_IMG],
                      [0.0, 0.0, 1.0]], dtype=jnp.float32)


def get_reverse_z():
    return jnp.array([[1.0, 0.0, 0.0],
                      [0.0, 1.0, 0.0],
                      [0.0, 0.0, -1.0]], dtype=jnp.float32)


def get_camera_pos():
    return jnp.array([[0.0, 0.0, CAM_Z]], dtype=jnp.float32)  # (1, 3)


# ----------------------------------------------------------------------------
# Glue: compute_rotation_matrix (tiny per-batch 3x3 construction, plain JAX)
# ----------------------------------------------------------------------------
def compute_rotation_matrix(angles):
    # angles: (B, 3) -> (B, 3, 3); matches BaseReconModel.compute_rotation_matrix
    sinx, siny, sinz = (jnp.sin(angles[:, i]) for i in range(3))
    cosx, cosy, cosz = (jnp.cos(angles[:, i]) for i in range(3))
    zeros = jnp.zeros_like(sinx)
    ones = jnp.ones_like(sinx)
    rotX = jnp.stack([jnp.stack([ones, zeros, zeros], -1),
                      jnp.stack([zeros, cosx, -sinx], -1),
                      jnp.stack([zeros, sinx, cosx], -1)], axis=1)
    rotY = jnp.stack([jnp.stack([cosy, zeros, siny], -1),
                      jnp.stack([zeros, ones, zeros], -1),
                      jnp.stack([-siny, zeros, cosy], -1)], axis=1)
    rotZ = jnp.stack([jnp.stack([cosz, -sinz, zeros], -1),
                      jnp.stack([sinz, cosz, zeros], -1),
                      jnp.stack([zeros, zeros, ones], -1)], axis=1)
    rotation = jnp.einsum("bij,bjk->bik", jnp.einsum("bij,bjk->bik", rotZ, rotY), rotX)
    return jnp.transpose(rotation, (0, 2, 1))


# ----------------------------------------------------------------------------
# Lane/sublane-dense layout helpers:  (B, N, C)  <->  (B, C, R, 128)
# ----------------------------------------------------------------------------
def _cdiv(a, b):
    return -(-a // b)


def _choose_tiling(n, batch):
    """Pick (S, R_pad): sublane rows per block (tile = S*128 lanes) and padded
    total 128-lane rows. Big tiles (1024/2048 lanes) for realistic N; the grid
    (B, R_pad/S) keeps >= 2 steps for v7x megacore whenever there is data."""
    r = max(1, _cdiv(n, LANE))
    if r < 8:
        # tiny inputs: single block; 2nd-minor block dim equals the full array dim
        return r, r
    s = 16 if r >= 32 else 8          # 2048- or 1024-lane tiles, >= 2 tiles for r >= 9
    return s, _cdiv(r, s) * s


def _to_lane_dense(x, r_pad):
    """(B, N, C) -> (B, C, r_pad, 128), zero-padded along N. Done ONCE at ingest."""
    B, N, C = x.shape
    n_pad = r_pad * LANE
    xt = jnp.swapaxes(x, 1, 2)                      # (B, C, N)
    if n_pad != N:
        xt = jnp.pad(xt, ((0, 0), (0, 0), (0, n_pad - N)))
    return xt.reshape(B, C, r_pad, LANE)


def _from_lane_dense(xt, n):
    """(B, C, R, 128) -> (B, N, C). Done ONCE at the module-API edge."""
    B, C = xt.shape[0], xt.shape[1]
    return jnp.swapaxes(xt.reshape(B, C, -1)[:, :, :n], 1, 2)


# ----------------------------------------------------------------------------
# Fused kernel: rigid_transform + project_vs + vertex-normal normalization
# ----------------------------------------------------------------------------
def _geometry_kernel(params_ref, vs_ref, vn_ref, vst_ref, proj_ref, nrm_ref):
    # params_ref: (B, 12) f32 in SMEM: rot (row-major 3x3) then trans (3)
    # vs_ref/vn_ref:   (1, 3, S, 128) sublane/lane-dense coordinate planes
    # vst_ref/nrm_ref: (1, 3, S, 128); proj_ref: (1, 2, S, 128)
    b = pl.program_id(0)
    r00 = params_ref[b, 0]; r01 = params_ref[b, 1]; r02 = params_ref[b, 2]
    r10 = params_ref[b, 3]; r11 = params_ref[b, 4]; r12 = params_ref[b, 5]
    r20 = params_ref[b, 6]; r21 = params_ref[b, 7]; r22 = params_ref[b, 8]
    tx = params_ref[b, 9]; ty = params_ref[b, 10]; tz = params_ref[b, 11]

    x = vs_ref[0, 0]        # (S, 128) dense slab
    y = vs_ref[0, 1]
    z = vs_ref[0, 2]

    # rigid_transform: vs_t = vs @ rot + trans
    xt = x * r00 + y * r10 + z * r20 + tx
    yt = x * r01 + y * r11 + z * r21 + ty
    zt = x * r02 + y * r12 + z * r22 + tz
    vst_ref[0, 0] = xt
    vst_ref[0, 1] = yt
    vst_ref[0, 2] = zt

    # project_vs with reverse_z / camera_pos / p_mat folded to constants:
    #   pz = 10 - z_t ; proj = F * (x_t, y_t) / pz + 256
    pz = CAM_Z - zt
    inv_pz = pl.reciprocal(pz, approx=True)        # EUP vrcp, off the VALU
    proj_ref[0, 0] = FOCAL * xt * inv_pz + HALF_IMG
    proj_ref[0, 1] = FOCAL * yt * inv_pz + HALF_IMG

    # compute_norm epilogue: per-vertex normalization (rsqrt on EUP).
    # eps clamp keeps zero-padded / degenerate lanes at 0 instead of NaN.
    nx = vn_ref[0, 0]
    ny = vn_ref[0, 1]
    nz = vn_ref[0, 2]
    inv_n = lax.rsqrt(jnp.maximum(nx * nx + ny * ny + nz * nz, 1e-30))
    nrm_ref[0, 0] = nx * inv_n
    nrm_ref[0, 1] = ny * inv_n
    nrm_ref[0, 2] = nz * inv_n


def _geometry_pallas(params, vs_ld, vn_ld, s):
    B, _, r_pad, _ = vs_ld.shape
    grid = (B, r_pad // s)
    blk3 = pl.BlockSpec((1, 3, s, LANE), lambda b, n: (b, 0, n, 0))
    blk2 = pl.BlockSpec((1, 2, s, LANE), lambda b, n: (b, 0, n, 0))
    return pl.pallas_call(
        _geometry_kernel,
        out_shape=(jax.ShapeDtypeStruct((B, 3, r_pad, LANE), jnp.float32),
                   jax.ShapeDtypeStruct((B, 2, r_pad, LANE), jnp.float32),
                   jax.ShapeDtypeStruct((B, 3, r_pad, LANE), jnp.float32)),
        grid=grid,
        in_specs=[pl.BlockSpec(memory_space=pltpu.MemorySpace.SMEM),   # rot+trans scalars
                  blk3,                                                # vs
                  blk3],                                               # vn sums
        out_specs=(blk3, blk2, blk3),
        compiler_params=pltpu.CompilerParams(
            dimension_semantics=("parallel", "parallel")),
    )(params, vs_ld, vn_ld)


# ----------------------------------------------------------------------------
# compute_norm: data-dependent gathers / cross / K-sum stay in plain JAX
# (XLA fuses gather+reduce); computed directly on the lane-dense view so no
# extra transposes are needed before the Pallas kernel.
# ----------------------------------------------------------------------------
def _vertex_normal_sums_lane_dense(vs_ld, tri, point_buf, n_verts):
    # TODO(synk): the tri / point_buf gathers are data-dependent; they remain
    # plain JAX, only the per-vertex normalization runs inside the Pallas kernel.
    B, _, r_pad, _ = vs_ld.shape
    flat = vs_ld.reshape(B, 3, r_pad * LANE)            # (B, 3, Np)
    v1 = flat[:, :, tri[:, 0]]
    v2 = flat[:, :, tri[:, 1]]
    v3 = flat[:, :, tri[:, 2]]
    fn = jnp.cross(v1 - v2, v2 - v3, axis=1)             # (B, 3, F)
    fn = jnp.concatenate([fn, jnp.zeros((B, 3, 1), fn.dtype)], axis=2)   # zero face
    vn = fn[:, :, point_buf].sum(axis=-1)                 # (B, 3, Nv)
    vn = jnp.pad(vn, ((0, 0), (0, 0), (0, r_pad * LANE - n_verts)))
    return vn.reshape(B, 3, r_pad, LANE)


# ----------------------------------------------------------------------------
# End-to-end pipeline (module semantics: (B,N,3) in, (B,N,C) out)
# ----------------------------------------------------------------------------
def base_recon_geometry(vs, angles, trans, tri, point_buf):
    B, N, _ = vs.shape
    rot = compute_rotation_matrix(angles)                                 # (B,3,3)
    params = jnp.concatenate([rot.reshape(B, 9), trans.reshape(B, 3)], axis=1)

    s, r_pad = _choose_tiling(N, B)
    vs_ld = _to_lane_dense(vs.astype(jnp.float32), r_pad)                 # one ingest relayout
    vn_ld = _vertex_normal_sums_lane_dense(vs_ld, tri, point_buf, N)

    vst_ld, proj_ld, nrm_ld = _geometry_pallas(params, vs_ld, vn_ld, s)

    # NOTE: downstream consumers would keep the lane-dense (B,C,R,128) layout;
    # convert back once here only to expose the module's (B,N,C) API.
    return (_from_lane_dense(vst_ld, N),
            _from_lane_dense(proj_ld, N),
            _from_lane_dense(nrm_ld, N),
            rot)


run_geometry = jax.jit(base_recon_geometry)


# ----------------------------------------------------------------------------
# Pure-JAX reference (semantics of the PyTorch module) for sanity checking
# ----------------------------------------------------------------------------
def _reference(vs, rot, trans, tri, point_buf):
    vs_t = jnp.einsum("bnk,bkj->bnj", vs, rot) + trans[:, None, :]
    rz = get_reverse_z()
    cam = get_camera_pos()[None]
    vs_p = jnp.einsum("bnk,kj->bnj", vs_t, rz) + cam
    aug = jnp.einsum("bnk,jk->bnj", vs_p, get_p_mat())
    proj = aug[:, :, :2] / aug[:, :, 2:3]
    v1 = vs[:, tri[:, 0], :]
    v2 = vs[:, tri[:, 1], :]
    v3 = vs[:, tri[:, 2], :]
    fn = jnp.cross(v1 - v2, v2 - v3)
    fn = jnp.concatenate([fn, jnp.zeros((vs.shape[0], 1, 3), fn.dtype)], axis=1)
    vn = fn[:, point_buf, :].sum(axis=2)
    vn = vn / jnp.linalg.norm(vn, axis=2, keepdims=True)
    return vs_t, proj, vn


# ----------------------------------------------------------------------------
if __name__ == "__main__":
    # Small but multi-tile shapes: Nv=1200 -> 10 rows of 128 lanes -> padded to
    # 16 rows, sublane tile S=8 -> grid (B=2, 2), block (1,3,8,128).
    B, Nv, F, K = 2, 1200, 2048, 8

    key = jax.random.PRNGKey(0)
    k_vs, k_ang, k_tr = jax.random.split(key, 3)

    vs = 0.5 * jax.random.normal(k_vs, (B, Nv, 3), dtype=jnp.float32)
    angles = 0.1 * jax.random.normal(k_ang, (B, 3), dtype=jnp.float32)
    trans = 0.1 * jax.random.normal(k_tr, (B, 3), dtype=jnp.float32)

    # deterministic init coefficients from the module's __init__
    id_tensor = jnp.asarray(ID_INIT)    # (1, 50)
    exp_tensor = jnp.asarray(EXP_INIT)  # (1, 47)
    # TODO(synk): forward()/get_vs()/get_lms()/init_coeff_dims() are abstract
    # (NotImplementedError) in BaseReconModel; only the concrete geometry
    # methods are realized as kernels.

    # deterministic topology
    tri = np.stack([np.arange(F) % Nv,
                    (np.arange(F) + 1) % Nv,
                    (np.arange(F) + 7) % Nv], axis=1).astype(np.int32)       # (F, 3)
    point_buf = ((np.arange(Nv)[:, None] * 3 + np.arange(K)[None, :])
                 % (F + 1)).astype(np.int32)                                 # (Nv, K)
    tri = jnp.asarray(tri)
    point_buf = jnp.asarray(point_buf)

    vs_t, proj, v_norm, rot = run_geometry(vs, angles, trans, tri, point_buf)
    jax.block_until_ready((vs_t, proj, v_norm))

    # sanity check vs pure-JAX reference
    ref_vs_t, ref_proj, ref_vn = _reference(vs, rot, trans, tri, point_buf)
    np.testing.assert_allclose(np.asarray(vs_t), np.asarray(ref_vs_t),
                               rtol=1e-5, atol=1e-5)
    # projection uses the EUP approximate reciprocal (pl.reciprocal approx=True);
    # worst-case error here is well below ~0.2 px on a 512-px image.
    np.testing.assert_allclose(np.asarray(proj), np.asarray(ref_proj),
                               rtol=2e-3, atol=0.5)
    np.testing.assert_allclose(np.asarray(v_norm), np.asarray(ref_vn),
                               rtol=1e-4, atol=1e-5)

    print("KERNEL_OK")
</pallas_src>

<mosaic_0001>
module attributes {stable_mosaic.version = 11 : i64} {
  func.func private @main(%arg0: i32) attributes {dimension_semantics = [#tpu.dimension_semantics<core_parallel>], iteration_bounds = array<i64: 2>, tpu.core_type = #tpu.core_type<sc_scalar_subcore>, window_params = []} {
    return
  }
}

module attributes {stable_mosaic.version = 11 : i64} {
  func.func private @main(%arg0: i32) attributes {dimension_semantics = [#tpu.dimension_semantics<core_parallel>], iteration_bounds = array<i64: 2>, tpu.core_type = #tpu.core_type<sc_scalar_subcore>, window_params = []} {
    return
  }
}

module attributes {stable_mosaic.version = 11 : i64} {
  func.func @_geometry_kernel(%arg0: i32, %arg1: i32, %arg2: memref<2x12xf32, #tpu.memory_space<smem>>, %arg3: memref<1x3x8x128xf32, #tpu.memory_space<vmem>>, %arg4: memref<1x3x8x128xf32, #tpu.memory_space<vmem>>, %arg5: memref<1x3x8x128xf32, #tpu.memory_space<vmem>>, %arg6: memref<1x2x8x128xf32, #tpu.memory_space<vmem>>, %arg7: memref<1x3x8x128xf32, #tpu.memory_space<vmem>>) attributes {dimension_semantics = [#tpu.dimension_semantics<parallel>, #tpu.dimension_semantics<parallel>], iteration_bounds = array<i64: 2, 2>, scalar_prefetch = 0 : i64, scratch_operands = 0 : i64, tpu.core_type = #tpu.core_type<tc>, window_params = [{transform_indices = @transform_0, window_bounds = array<i64: 2, 12>}, {transform_indices = @transform_1, window_bounds = array<i64: 1, 3, 8, 128>}, {transform_indices = @transform_2, window_bounds = array<i64: 1, 3, 8, 128>}, {transform_indices = @transform_3, window_bounds = array<i64: 1, 3, 8, 128>}, {transform_indices = @transform_4, window_bounds = array<i64: 1, 2, 8, 128>}, {transform_indices = @transform_5, window_bounds = array<i64: 1, 3, 8, 128>}]} {
    %0 = arith.index_cast %arg0 : i32 to index
    %c0 = arith.constant 0 : index
    %1 = memref.load %arg2[%0, %c0] : memref<2x12xf32, #tpu.memory_space<smem>>
    %2 = arith.index_cast %arg0 : i32 to index
    %c1 = arith.constant 1 : index
    %3 = memref.load %arg2[%2, %c1] : memref<2x12xf32, #tpu.memory_space<smem>>
    %4 = arith.index_cast %arg0 : i32 to index
    %c2 = arith.constant 2 : index
    %5 = memref.load %arg2[%4, %c2] : memref<2x12xf32, #tpu.memory_space<smem>>
    %6 = arith.index_cast %arg0 : i32 to index
    %c3 = arith.constant 3 : index
    %7 = memref.load %arg2[%6, %c3] : memref<2x12xf32, #tpu.memory_space<smem>>
    %8 = arith.index_cast %arg0 : i32 to index
    %c4 = arith.constant 4 : index
    %9 = memref.load %arg2[%8, %c4] : memref<2x12xf32, #tpu.memory_space<smem>>
    %10 = arith.index_cast %arg0 : i32 to index
    %c5 = arith.constant 5 : index
    %11 = memref.load %arg2[%10, %c5] : memref<2x12xf32, #tpu.memory_space<smem>>
    %12 = arith.index_cast %arg0 : i32 to index
    %c6 = arith.constant 6 : index
    %13 = memref.load %arg2[%12, %c6] : memref<2x12xf32, #tpu.memory_space<smem>>
    %14 = arith.index_cast %arg0 : i32 to index
    %c7 = arith.constant 7 : index
    %15 = memref.load %arg2[%14, %c7] : memref<2x12xf32, #tpu.memory_space<smem>>
    %16 = arith.index_cast %arg0 : i32 to index
    %c8 = arith.constant 8 : index
    %17 = memref.load %arg2[%16, %c8] : memref<2x12xf32, #tpu.memory_space<smem>>
    %18 = arith.index_cast %arg0 : i32 to index
    %c9 = arith.constant 9 : index
    %19 = memref.load %arg2[%18, %c9] : memref<2x12xf32, #tpu.memory_space<smem>>
    %20 = arith.index_cast %arg0 : i32 to index
    %c10 = arith.constant 10 : index
    %21 = memref.load %arg2[%20, %c10] : memref<2x12xf32, #tpu.memory_space<smem>>
    %22 = arith.index_cast %arg0 : i32 to index
    %c11 = arith.constant 11 : index
    %23 = memref.load %arg2[%22, %c11] : memref<2x12xf32, #tpu.memory_space<smem>>
    %c0_0 = arith.constant 0 : index
    %c0_1 = arith.constant 0 : index
    %c0_2 = arith.constant 0 : index
    %c0_3 = arith.constant 0 : index
    %24 = vector.load %arg3[%c0_0, %c0_1, %c0_2, %c0_3] : memref<1x3x8x128xf32, #tpu.memory_space<vmem>>, vector<1x1x8x128xf32>
    %25 = vector.shape_cast %24 : vector<1x1x8x128xf32> to vector<8x128xf32>
    %c0_4 = arith.constant 0 : index
    %c1_5 = arith.constant 1 : index
    %c0_6 = arith.constant 0 : index
    %c0_7 = arith.constant 0 : index
    %26 = vector.load %arg3[%c0_4, %c1_5, %c0_6, %c0_7] : memref<1x3x8x128xf32, #tpu.memory_space<vmem>>, vector<1x1x8x128xf32>
    %27 = vector.shape_cast %26 : vector<1x1x8x128xf32> to vector<8x128xf32>
    %c0_8 = arith.constant 0 : index
    %c2_9 = arith.constant 2 : index
    %c0_10 = arith.constant 0 : index
    %c0_11 = arith.constant 0 : index
    %28 = vector.load %arg3[%c0_8, %c2_9, %c0_10, %c0_11] : memref<1x3x8x128xf32, #tpu.memory_space<vmem>>, vector<1x1x8x128xf32>
    %29 = vector.shape_cast %28 : vector<1x1x8x128xf32> to vector<8x128xf32>
    %30 = vector.broadcast %1 : f32 to vector<8x128xf32>
    %31 = arith.mulf %25, %30 : vector<8x128xf32>
    %32 = vector.broadcast %7 : f32 to vector<8x128xf32>
    %33 = arith.mulf %27, %32 : vector<8x128xf32>
    %34 = arith.addf %31, %33 : vector<8x128xf32>
    %35 = vector.broadcast %13 : f32 to vector<8x128xf32>
    %36 = arith.mulf %29, %35 : vector<8x128xf32>
    %37 = arith.addf %34, %36 : vector<8x128xf32>
    %38 = vector.broadcast %19 : f32 to vector<8x128xf32>
    %39 = arith.addf %37, %38 : vector<8x128xf32>
    %40 = vector.broadcast %3 : f32 to vector<8x128xf32>
    %41 = arith.mulf %25, %40 : vector<8x128xf32>
    %42 = vector.broadcast %9 : f32 to vector<8x128xf32>
    %43 = arith.mulf %27, %42 : vector<8x128xf32>
    %44 = arith.addf %41, %43 : vector<8x128xf32>
    %45 = vector.broadcast %15 : f32 to vector<8x128xf32>
    %46 = arith.mulf %29, %45 : vector<8x128xf32>
    %47 = arith.addf %44, %46 : vector<8x128xf32>
    %48 = vector.broadcast %21 : f32 to vector<8x128xf32>
    %49 = arith.addf %47, %48 : vector<8x128xf32>
    %50 = vector.broadcast %5 : f32 to vector<8x128xf32>
    %51 = arith.mulf %25, %50 : vector<8x128xf32>
    %52 = vector.broadcast %11 : f32 to vector<8x128xf32>
    %53 = arith.mulf %27, %52 : vector<8x128xf32>
    %54 = arith.addf %51, %53 : vector<8x128xf32>
    %55 = vector.broadcast %17 : f32 to vector<8x128xf32>
    %56 = arith.mulf %29, %55 : vector<8x128xf32>
    %57 = arith.addf %54, %56 : vector<8x128xf32>
    %58 = vector.broadcast %23 : f32 to vector<8x128xf32>
    %59 = arith.addf %57, %58 : vector<8x128xf32>
    %c0_12 = arith.constant 0 : index
    %c0_13 = arith.constant 0 : index
    %c0_14 = arith.constant 0 : index
    %c0_15 = arith.constant 0 : index
    %60 = vector.load %arg5[%c0_12, %c0_13, %c0_14, %c0_15] : memref<1x3x8x128xf32, #tpu.memory_space<vmem>>, vector<1x1x8x128xf32>
    %61 = vector.shape_cast %60 : vector<1x1x8x128xf32> to vector<8x128xf32>
    %62 = vector.shape_cast %39 : vector<8x128xf32> to vector<1x1x8x128xf32>
    tpu.vector_store %arg5[%c0_12, %c0_13, %c0_14, %c0_15], %62 {strides = array<i32>} : memref<1x3x8x128xf32, #tpu.memory_space<vmem>>, vector<1x1x8x128xf32>,
    %c0_16 = arith.constant 0 : index
    %c1_17 = arith.constant 1 : index
    %c0_18 = arith.constant 0 : index
    %c0_19 = arith.constant 0 : index
    %63 = vector.load %arg5[%c0_16, %c1_17, %c0_18, %c0_19] : memref<1x3x8x128xf32, #tpu.memory_space<vmem>>, vector<1x1x8x128xf32>
    %64 = vector.shape_cast %63 : vector<1x1x8x128xf32> to vector<8x128xf32>
    %65 = vector.shape_cast %49 : vector<8x128xf32> to vector<1x1x8x128xf32>
    tpu.vector_store %arg5[%c0_16, %c1_17, %c0_18, %c0_19], %65 {strides = array<i32>} : memref<1x3x8x128xf32, #tpu.memory_space<vmem>>, vector<1x1x8x128xf32>,
    %c0_20 = arith.constant 0 : index
    %c2_21 = arith.constant 2 : index
    %c0_22 = arith.constant 0 : index
    %c0_23 = arith.constant 0 : index
    %66 = vector.load %arg5[%c0_20, %c2_21, %c0_22, %c0_23] : memref<1x3x8x128xf32, #tpu.memory_space<vmem>>, vector<1x1x8x128xf32>
    %67 = vector.shape_cast %66 : vector<1x1x8x128xf32> to vector<8x128xf32>
    %68 = vector.shape_cast %59 : vector<8x128xf32> to vector<1x1x8x128xf32>
    tpu.vector_store %arg5[%c0_20, %c2_21, %c0_22, %c0_23], %68 {strides = array<i32>} : memref<1x3x8x128xf32, #tpu.memory_space<vmem>>, vector<1x1x8x128xf32>,
    %cst = arith.constant 1.000000e+01 : f32
    %69 = vector.broadcast %cst : f32 to vector<8x128xf32>
    %70 = arith.subf %69, %59 : vector<8x128xf32>
    %71 = tpu.reciprocal %70 {approx = true} : vector<8x128xf32> -> vector<8x128xf32>
    %cst_24 = arith.constant 1.015000e+03 : f32
    %72 = vector.broadcast %cst_24 : f32 to vector<8x128xf32>
    %73 = arith.mulf %72, %39 : vector<8x128xf32>
    %74 = arith.mulf %73, %71 : vector<8x128xf32>
    %cst_25 = arith.constant 2.560000e+02 : f32
    %75 = vector.broadcast %cst_25 : f32 to vector<8x128xf32>
    %76 = arith.addf %74, %75 : vector<8x128xf32>
    %c0_26 = arith.constant 0 : index
    %c0_27 = arith.constant 0 : index
    %c0_28 = arith.constant 0 : index
    %c0_29 = arith.constant 0 : index
    %77 = vector.load %arg6[%c0_26, %c0_27, %c0_28, %c0_29] : memref<1x2x8x128xf32, #tpu.memory_space<vmem>>, vector<1x1x8x128xf32>
    %78 = vector.shape_cast %77 : vector<1x1x8x128xf32> to vector<8x128xf32>
    %79 = vector.shape_cast %76 : vector<8x128xf32> to vector<1x1x8x128xf32>
    tpu.vector_store %arg6[%c0_26, %c0_27, %c0_28, %c0_29], %79 {strides = array<i32>} : memref<1x2x8x128xf32, #tpu.memory_space<vmem>>, vector<1x1x8x128xf32>,
    %cst_30 = arith.constant 1.015000e+03 : f32
    %80 = vector.broadcast %cst_30 : f32 to vector<8x128xf32>
    %81 = arith.mulf %80, %49 : vector<8x128xf32>
    %82 = arith.mulf %81, %71 : vector<8x128xf32>
    %cst_31 = arith.constant 2.560000e+02 : f32
    %83 = vector.broadcast %cst_31 : f32 to vector<8x128xf32>
    %84 = arith.addf %82, %83 : vector<8x128xf32>
    %c0_32 = arith.constant 0 : index
    %c1_33 = arith.constant 1 : index
    %c0_34 = arith.constant 0 : index
    %c0_35 = arith.constant 0 : index
    %85 = vector.load %arg6[%c0_32, %c1_33, %c0_34, %c0_35] : memref<1x2x8x128xf32, #tpu.memory_space<vmem>>, vector<1x1x8x128xf32>
    %86 = vector.shape_cast %85 : vector<1x1x8x128xf32> to vector<8x128xf32>
    %87 = vector.shape_cast %84 : vector<8x128xf32> to vector<1x1x8x128xf32>
    tpu.vector_store %arg6[%c0_32, %c1_33, %c0_34, %c0_35], %87 {strides = array<i32>} : memref<1x2x8x128xf32, #tpu.memory_space<vmem>>, vector<1x1x8x128xf32>,
    %c0_36 = arith.constant 0 : index
    %c0_37 = arith.constant 0 : index
    %c0_38 = arith.constant 0 : index
    %c0_39 = arith.constant 0 : index
    %88 = vector.load %arg4[%c0_36, %c0_37, %c0_38, %c0_39] : memref<1x3x8x128xf32, #tpu.memory_space<vmem>>, vector<1x1x8x128xf32>
    %89 = vector.shape_cast %88 : vector<1x1x8x128xf32> to vector<8x128xf32>
    %c0_40 = arith.constant 0 : index
    %c1_41 = arith.constant 1 : index
    %c0_42 = arith.constant 0 : index
    %c0_43 = arith.constant 0 : index
    %90 = vector.load %arg4[%c0_40, %c1_41, %c0_42, %c0_43] : memref<1x3x8x128xf32, #tpu.memory_space<vmem>>, vector<1x1x8x128xf32>
    %91 = vector.shape_cast %90 : vector<1x1x8x128xf32> to vector<8x128xf32>
    %c0_44 = arith.constant 0 : index
    %c2_45 = arith.constant 2 : index
    %c0_46 = arith.constant 0 : index
    %c0_47 = arith.constant 0 : index
    %92 = vector.load %arg4[%c0_44, %c2_45, %c0_46, %c0_47] : memref<1x3x8x128xf32, #tpu.memory_space<vmem>>, vector<1x1x8x128xf32>
    %93 = vector.shape_cast %92 : vector<1x1x8x128xf32> to vector<8x128xf32>
    %94 = arith.mulf %89, %89 : vector<8x128xf32>
    %95 = arith.mulf %91, %91 : vector<8x128xf32>
    %96 = arith.addf %94, %95 : vector<8x128xf32>
    %97 = arith.mulf %93, %93 : vector<8x128xf32>
    %98 = arith.addf %96, %97 : vector<8x128xf32>
    %cst_48 = arith.constant 1.000000e-30 : f32
    %99 = vector.broadcast %cst_48 : f32 to vector<8x128xf32>
    %100 = arith.maximumf %98, %99 : vector<8x128xf32>
    %101 = math.rsqrt %100 : vector<8x128xf32>
    %102 = arith.mulf %89, %101 : vector<8x128xf32>
    %c0_49 = arith.constant 0 : index
    %c0_50 = arith.constant 0 : index
    %c0_51 = arith.constant 0 : index
    %c0_52 = arith.constant 0 : index
    %103 = vector.load %arg7[%c0_49, %c0_50, %c0_51, %c0_52] : memref<1x3x8x128xf32, #tpu.memory_space<vmem>>, vector<1x1x8x128xf32>
    %104 = vector.shape_cast %103 : vector<1x1x8x128xf32> to vector<8x128xf32>
    %105 = vector.shape_cast %102 : vector<8x128xf32> to vector<1x1x8x128xf32>
    tpu.vector_store %arg7[%c0_49, %c0_50, %c0_51, %c0_52], %105 {strides = array<i32>} : memref<1x3x8x128xf32, #tpu.memory_space<vmem>>, vector<1x1x8x128xf32>,
    %106 = arith.mulf %91, %101 : vector<8x128xf32>
    %c0_53 = arith.constant 0 : index
    %c1_54 = arith.constant 1 : index
    %c0_55 = arith.constant 0 : index
    %c0_56 = arith.constant 0 : index
    %107 = vector.load %arg7[%c0_53, %c1_54, %c0_55, %c0_56] : memref<1x3x8x128xf32, #tpu.memory_space<vmem>>, vector<1x1x8x128xf32>
    %108 = vector.shape_cast %107 : vector<1x1x8x128xf32> to vector<8x128xf32>
    %109 = vector.shape_cast %106 : vector<8x128xf32> to vector<1x1x8x128xf32>
    tpu.vector_store %arg7[%c0_53, %c1_54, %c0_55, %c0_56], %109 {strides = array<i32>} : memref<1x3x8x128xf32, #tpu.memory_space<vmem>>, vector<1x1x8x128xf32>,
    %110 = arith.mulf %93, %101 : vector<8x128xf32>
    %c0_57 = arith.constant 0 : index
    %c2_58 = arith.constant 2 : index
    %c0_59 = arith.constant 0 : index
    %c0_60 = arith.constant 0 : index
    %111 = vector.load %arg7[%c0_57, %c2_58, %c0_59, %c0_60] : memref<1x3x8x128xf32, #tpu.memory_space<vmem>>, vector<1x1x8x128xf32>
    %112 = vector.shape_cast %111 : vector<1x1x8x128xf32> to vector<8x128xf32>
    %113 = vector.shape_cast %110 : vector<8x128xf32> to vector<1x1x8x128xf32>
    tpu.vector_store %arg7[%c0_57, %c2_58, %c0_59, %c0_60], %113 {strides = array<i32>} : memref<1x3x8x128xf32, #tpu.memory_space<vmem>>, vector<1x1x8x128xf32>,
    return
  }
  func.func @transform_0(%arg0: i32, %arg1: i32) -> (i32, i32) {
    %c0_i32 = arith.constant 0 : i32
    %c0_i32_0 = arith.constant 0 : i32
    %c0_i32_1 = arith.constant 0 : i32
    return %c0_i32, %c0_i32_0 : i32, i32
  }
  func.func @transform_1(%arg0: i32, %arg1: i32) -> (i32, i32, i32, i32) {
    %c0_i32 = arith.constant 0 : i32
    %c0_i32_0 = arith.constant 0 : i32
    %c0_i32_1 = arith.constant 0 : i32
    return %arg0, %c0_i32, %arg1, %c0_i32_0 : i32, i32, i32, i32
  }
  func.func @transform_2(%arg0: i32, %arg1: i32) -> (i32, i32, i32, i32) {
    %c0_i32 = arith.constant 0 : i32
    %c0_i32_0 = arith.constant 0 : i32
    %c0_i32_1 = arith.constant 0 : i32
    return %arg0, %c0_i32, %arg1, %c0_i32_0 : i32, i32, i32, i32
  }
  func.func @transform_3(%arg0: i32, %arg1: i32) -> (i32, i32, i32, i32) {
    %c0_i32 = arith.constant 0 : i32
    %c0_i32_0 = arith.constant 0 : i32
    %c0_i32_1 = arith.constant 0 : i32
    return %arg0, %c0_i32, %arg1, %c0_i32_0 : i32, i32, i32, i32
  }
  func.func @transform_4(%arg0: i32, %arg1: i32) -> (i32, i32, i32, i32) {
    %c0_i32 = arith.constant 0 : i32
    %c0_i32_0 = arith.constant 0 : i32
    %c0_i32_1 = arith.constant 0 : i32
    return %arg0, %c0_i32, %arg1, %c0_i32_0 : i32, i32, i32, i32
  }
  func.func @transform_5(%arg0: i32, %arg1: i32) -> (i32, i32, i32, i32) {
    %c0_i32 = arith.constant 0 : i32
    %c0_i32_0 = arith.constant 0 : i32
    %c0_i32_1 = arith.constant 0 : i32
    return %arg0, %c0_i32, %arg1, %c0_i32_0 : i32, i32, i32, i32
  }
}

</mosaic_0001>

<bundles_post_ra>
// kernel: base_recon_geometry.1
= control target key start
LH: loop header
LB: loop body
LE: loop exit
PB: predicated region body
PF: predicated region fallthrough
CT: control target
= control target key end

     0   :  { %s1210_s0 = inlined_call_operand.vmem [shape: f32[2,12], index: 0, kind: input, shape index: {}]   ;;  %s1211_s1 = inlined_call_operand.vmem [shape: f32[2,3,16,128], index: 1, kind: input, shape index: {}]   ;;  %s1212_s2 = inlined_call_operand.vmem [shape: f32[2,3,16,128], index: 2, kind: input, shape index: {}]   ;;  %s1213_s3 = inlined_call_operand.vmem [shape: f32[2,3,16,128], index: 3, kind: output, shape index: {0}]   ;;  %s1214_s4 = inlined_call_operand.vmem [shape: f32[2,2,16,128], index: 4, kind: output, shape index: {1}]   ;;  %s1215_s5 = inlined_call_operand.vmem [shape: f32[2,3,16,128], index: 5, kind: output, shape index: {2}]  }
   0x1   :  { %1218 = sst [smem:[#allocation10_spill]] %s1210_s0 }
   0x2   :  { %1219 = sst [smem:[#allocation11_spill]] %s1211_s1 }
   0x3   :  { %1220 = sst [smem:[#allocation12_spill]] %s1212_s2 }
   0x4   :  { %11 = vsyncpa [#allocation3], 0  ;;  %s995_s18 = smov 0   ;;  %s997_s19 = smov 0  }
   0x5   :  { %s999_s20 = smov 0   ;;  %s1001_s21 = smov 0  }
   0x6   :  { %s1003_s22 = smov 0   ;;  %s1005_s23 = smov 0  }
   0x7   :  { %s1007_s24 = smov 0  }
   0x8 LB: > { %s784_s25 = sadd.s32 4294967295, %s962_s24   ;;  %s26_s26 = sadd.s32 1, %s954_s22  ;;  %s962_s24 = sphi %s1007_s24, %s17_s24   ;;  %s958_s23 = sphi %s1005_s23, %s1238_s23   ;;  %s954_s22 = sphi %s1003_s22, %s1237_s22   ;;  %s950_s21 = sphi %s1001_s21, %s1236_s21   ;;  %s946_s20 = sphi %s999_s20, %s1235_s20   ;;  %s942_s19 = sphi %s997_s19, %s1234_s19   ;;  %s938_s18 = sphi %s995_s18, %s1233_s18  }
   0x9   : > { %p27_p0 = scmp.ge.s32.totalorder %s26_s26, 2  ;;  %s29_s27 = sadd.s32 1, %s958_s23 }
   0xa   : > { %s59_s28 = sadd.s32 1, %s942_s19  ;;  %p66_p1 = scmp.ne.s32.totalorder %s942_s19, %s938_s18 }
   0xb   : > { %s1240_s26 = smov (%p27_p0, %s26_s26), 0  ;;  %s1242_s27 = smov (!%p27_p0, %s29_s27), %s958_s23 }
   0xc   : > { %s55_s29 = ssub.s32 %s954_s22, %s1240_s26  ;;  %p67_p2 = scmp.eq.s32.totalorder %s962_s24, 0 }
   0xd   : > { %p31_p3 = scmp.ge.s32.totalorder %s1242_s27, 2  ;;  %p126_p4 = scmp.eq.s32.totalorder %s784_s25, 3 }
   0xe   : > { %p1042_p5 = por %p67_p2, %p66_p1  ;;  %p786_p6 = scmp.ge.s32.totalorder %s962_s24, 1 }
   0xf   : > { %s1244_s27 = smov (%p31_p3, %s1242_s27), 0  ;;  %p1049_p7 = por %p126_p4, %p66_p1 }
  0x10   : > { %p195_p8 = scmp.lt.s32.totalorder %s962_s24, 5  ;;  %s54_s7 = ssub.s32 %s958_s23, %s1244_s27 }
  0x11   : > { %s1222_s6 = scalar_select %p1049_p7, 1, 0 }
  0x12   : > { %s56_s8 = sor.u32 %s55_s29, %s54_s7  ;;  %p1056_p9 = pnand %p786_p6, %p195_p8 }
  0x13   : > { %p57_p10 = scmp.eq.s32.totalorder %s56_s8, 0  ;;  %p1060_p11 = scmp.eq.s32.totalorder %s784_s25, 0 }
  0x14   : > { %s1223_s9 = scalar_select %p1056_p9, 1, 0 }
  0x15   : > { %p822_p12 = pneg %p1056_p9  ;;  %s1225_s0 = sld [smem:[#allocation10_spill]] }
  0x16   : > { %s1070_s14 = scalar_select %p57_p10, %s942_s19, %s59_s28  }
  0x17   : > { %p823_p13 = pnand %p1060_p11, %p822_p12 }
  0x19   : > { %p891_p1 = pneg %p823_p13 }
  0x1b   : > { %s208_s13 = sshll.u32 %s1225_s0, 4  ;;  %s209_s13 = int_to_ptr.vmem [resolvable:$true] %s208_s13 }
  0x1c   : > { %s889_s15 = scalar_lea.vmem %s209_s13, 32  ;;  %p897_p4 = scmp.lt.s32.totalorder %s209_s13, %s209_s13 }
  0x1d   : > { %p890_p0 = scmp.ne.s32.totalorder %s209_s13, %s889_s15  ;;  %p898_p6 = scmp.lt.s32.totalorder %s889_s15, %s889_s15 }
  0x1f   : > { %p892_p2 = pnand %p891_p1, %p890_p0  ;;  %p899_p8 = por %p898_p6, %p897_p4 }
  0x21   : > { %p893_p3 = pneg %p892_p2 }
  0x23   : > { %p900_p7 = pnand %p899_p8, %p893_p3 }
  0x25   : > { %903 = shalt.err (!%p900_p7)
}
  0x26   : > { %s964_s16 = smov [#allocation2]   ;;  %p788_p9 = scmp.ge.s32.totalorder %s962_s24, 4 }
  0x27   : > { %825 = dma.vmem_to_smem (!%p823_p13), %s209_s13, 32, %s964_s16, [#allocation3]  }
  0x28   : > { %215 = sbr.rel (%p788_p9) target bundleno = 69 (0x45), region = 20 }
  0x2f   : > { %218 = sbr.rel (!%p1042_p5) target bundleno = 58 (0x3a), region = 24  ;;  %s220_s17 = sand.u32 (%p1042_p5), 1, %s942_s19  }
  0x30   : > { %s812_s25 = smul.u32 (%p1042_p5), 6, %s958_s23  ;;  %s1226_s1 = sld [smem:[#allocation11_spill]] (%p1042_p5) }
  0x31   : > { %s811_s28 = smul.u32 (%p1042_p5), 24, %s220_s17 }
  0x32   : > { %s224_s29 = sadd.s32 (%p1042_p5), %s954_s22, %s812_s25 }
  0x33   : > { %s789_s7 = sshll.u32 (%p1042_p5), %s224_s29, 3  ;;  %s222_s13 = scalar_lea.vmem (%p1042_p5), [#allocation4], %s811_s28 }
  0x36   : > { %s226_s12 = scalar_lea.vmem %s1226_s1, %s789_s7 }
  0x37   : > { %v258_v0 = vld [vmem:[%s226_s12] sm:$0xff]  ;;  %v260_v1 = vld [vmem:[%s226_s12 + $0x10] sm:$0xff] }
  0x38   : > { %v262_v2 = vld [vmem:[%s226_s12 + $0x20] sm:$0xff]  ;;  %259 = vst [vmem:[%s222_s13] sm:$0xff] %v258_v0  ;;  %261 = vst [vmem:[%s222_s13 + $0x8] sm:$0xff] %v260_v1 }
  0x39   : > { %263 = vst [vmem:[%s222_s13 + $0x10] sm:$0xff] %v262_v2 }
  0x3a PF: > { %269 = sbr.rel (!%p1042_p5) target bundleno = 69 (0x45), region = 62  ;;  %s271_s15 = sand.u32 (%p1042_p5), 1, %s942_s19  }
  0x3b   : > { %s814_s16 = smul.u32 (%p1042_p5), 6, %s958_s23  ;;  %s1227_s2 = sld [smem:[#allocation12_spill]] (%p1042_p5) }
  0x3c   : > { %s813_s17 = smul.u32 (%p1042_p5), 24, %s271_s15 }
  0x3d   : > { %s275_s25 = sadd.s32 (%p1042_p5), %s954_s22, %s814_s16 }
  0x3e   : > { %s790_s29 = sshll.u32 (%p1042_p5), %s275_s25, 3  ;;  %s273_s28 = scalar_lea.vmem (%p1042_p5), [#allocation5], %s813_s17 }
  0x41   : > { %s277_s11 = scalar_lea.vmem %s1227_s2, %s790_s29 }
  0x42   : > { %v309_v3 = vld [vmem:[%s277_s11] sm:$0xff]  ;;  %v311_v4 = vld [vmem:[%s277_s11 + $0x10] sm:$0xff] }
  0x43   : > { %v313_v5 = vld [vmem:[%s277_s11 + $0x20] sm:$0xff]  ;;  %310 = vst [vmem:[%s273_s28] sm:$0xff] %v309_v3  ;;  %312 = vst [vmem:[%s273_s28 + $0x8] sm:$0xff] %v311_v4 }
  0x44   : > { %314 = vst [vmem:[%s273_s28 + $0x10] sm:$0xff] %v313_v5 }
  0x45 PF: > { %p1228_p5 = scmp.ne.s32.totalorder %s1223_s9, 0 }
  0x47   : > { %323 = sbr.rel (%p1228_p5) target bundleno = 145 (0x91), region = 100 }
  0x4e   : > { %933 = dma.done.wait (%p1060_p11), [#allocation3], 32  }
  0x4f   : > { %935 = vsyncadd (%p1060_p11), [#allocation3], 4294967264  ;;  %s1217_s30 = sand.u32 1, %s938_s18  }
  0x50   : > { %s1100_s12 = smul.u32 24, %s1217_s30 }
  0x52   : > { %s1103_s13 = scalar_lea.vmem [#allocation4], %s1100_s12  ;;  %s339_s15 = scalar_lea.vmem [#allocation5], %s1100_s12 }
  0x53   : > { %343 = sfence }
  0x54   : > { %s1107_s9 = sshll.u32 %s950_s21, 7  ;;  %v1111_v6 = vld [vmem:[%s339_s15] sm:$0xff]  ;;  %v1113_v7 = vld [vmem:[%s339_s15 + $0x8] sm:$0xff]  ;;  %v1115_v8 = vld [vmem:[%s339_s15 + $0x10] sm:$0xff]  ;;  %p1230_p7 = scmp.ne.s32.totalorder %s1222_s6, 0 }
  0x55   : > { %s377_s10 = sld [smem:[#allocation2 + %s1107_s9]]  ;;  %s382_s16 = sadd.s32 3, %s1107_s9  ;;  %v456_v9 = vmul.f32 %v1111_v6, %v1111_v6  ;;  %v457_v10 = vmul.f32 %v1113_v7, %v1113_v7  ;;  %v459_v11 = vmul.f32 %v1115_v8, %v1115_v8  ;;  %v400_v14 = vld [vmem:[%s1103_s13] sm:$0xff]  ;;  %v795_v16 = vld [vmem:[%s1103_s13 + $0x8] sm:$0xff]  ;;  %v796_v20 = vld [vmem:[%s1103_s13 + $0x10] sm:$0xff] }
  0x56   : > { %s383_s17 = sld [smem:[#allocation2 + %s382_s16]]  ;;  %s388_s25 = sadd.s32 6, %s1107_s9 }
  0x57   : > { %s389_s29 = sld [smem:[#allocation2 + %s388_s25]]  ;;  %s394_s7 = sadd.s32 9, %s1107_s9  ;;  %v458_v12 = vadd.f32 %v457_v10, %v456_v9 }
  0x58   : > { %s1125_s8 = sld [smem:[#allocation2 + %s394_s7]]  ;;  %s378_s11 = sadd.s32 1, %s1107_s9 }
  0x59   : > { %s379_s28 = sld [smem:[#allocation2 + %s378_s11]]  ;;  %s384_s15 = sadd.s32 4, %s1107_s9  ;;  %v460_v13 = vadd.f32 %v459_v11, %v458_v12 }
  0x5a   : > { %s1129_s16 = sld [smem:[#allocation2 + %s384_s15]]  ;;  %s390_s30 = sadd.s32 7, %s1107_s9 }
  0x5b   : > { %v405_v15 = vstv %s377_s10  ;;  %s391_s0 = sld [smem:[#allocation2 + %s390_s30]]  ;;  %s396_s1 = sadd.s32 10, %s1107_s9  ;;  %v461_v19 = vmax.f32 %v460_v13, 1e-30 }
  0x5c   : > { %v406_v17 = vmul.f32 %v405_v15, %v400_v14  ;;  %v407_v18 = vstv %s383_s17  ;;  %s1135_s25 = sld [smem:[#allocation2 + %s396_s1]]  ;;  %s380_s7 = sadd.s32 2, %s1107_s9 }
  0x5d   : > { %v408_v21 = vmul.f32 %v795_v16, %v407_v18  ;;  %v410_v22 = vstv %s389_s29  ;;  %s381_s11 = sld [smem:[#allocation2 + %s380_s7]]  ;;  %s386_s15 = sadd.s32 5, %s1107_s9  ;;  %885 = vrsqrt.f32 %v461_v19 }
  0x5e   : > { %v411_v23 = vmul.f32 %v796_v20, %v410_v22  ;;  %s387_s10 = sld [smem:[#allocation2 + %s386_s15]]  ;;  %s392_s2 = sadd.s32 8, %s1107_s9  ;;  %v413_v26 = vstv %s1125_s8 }
  0x5f   : > { %v409_v24 = vadd.f32 %v408_v21, %v406_v17  ;;  %v415_v25 = vstv %s379_s28  ;;  %s393_s30 = sld [smem:[#allocation2 + %s392_s2]]  ;;  %s398_s1 = sadd.s32 11, %s1107_s9 }
  0x60   : > { %v416_v27 = vmul.f32 %v415_v25, %v400_v14  ;;  %v417_v28 = vstv %s1129_s16  ;;  %s399_s17 = sld [smem:[#allocation2 + %s398_s1]]  ;;  %s1146_s13 = scalar_lea.vmem [#allocation6], %s1100_s12 }
  0x61   : > { %v412_v29 = vadd.f32 %v411_v23, %v409_v24  ;;  %v418_v30 = vmul.f32 %v795_v16, %v417_v28  ;;  %v420_v31 = vstv %s391_s0  ;;  %s1154_s0 = scalar_lea.vmem [#allocation8], %s1100_s12  ;;  %s1229_s2 = sand.u32 1, %s938_s18  }
  0x62   : > { %v421_v32 = vmul.f32 %v796_v20, %v420_v31  ;;  %v423_v36 = vstv %s1135_s25  ;;  %s793_s9 = sshll.u32 %s1229_s2, 4  ;;  %s816_s29 = smul.u32 (%p1230_p7), 6, %s950_s21 }
  0x63   : > { %v414_v33 = vadd.f32 %v413_v26, %v412_v29  ;;  %v419_v34 = vadd.f32 %v418_v30, %v416_v27  ;;  %v425_v35 = vstv %s381_s11  ;;  %s369_s12 = scalar_lea.vmem [#allocation7], %s793_s9 }
  0x64   : > { %v426_v37 = vmul.f32 %v425_v35, %v400_v14  ;;  %v427_v38 = vstv %s387_s10  ;;  %s487_s8 = sadd.s32 (%p1230_p7), %s946_s20, %s816_s29 }
  0x65   : > { %435 = vst [vmem:[%s1146_s13] sm:$0xff] %v414_v33  ;;  %v422_v39 = vadd.f32 %v421_v32, %v419_v34  ;;  %v428_v40 = vmul.f32 %v795_v16, %v427_v38  ;;  %v430_v41 = vstv %s393_s30  ;;  %v442_v53 = vmul.f32 1015.0, %v414_v33  ;;  %s805_s18 = sshll.u32 (%p1230_p7), %s487_s8, 3 }
  0x66   : > { %v431_v42 = vmul.f32 %v796_v20, %v430_v41  ;;  %v433_v46 = vstv %s399_s17  ;;  %s489_s25 = scalar_lea.vmem (%p1230_p7), %s1213_s3, %s805_s18 }
  0x67   : > { %v424_v43 = vadd.f32 %v423_v36, %v422_v39  ;;  %v429_v44 = vadd.f32 %v428_v40, %v426_v37  ;;  %v886_v45 = vpop.eup %885 }
  0x68   : > { %v463_v48 = vmul.f32 %v886_v45, %v1111_v6  ;;  %v465_v49 = vmul.f32 %v886_v45, %v1113_v7  ;;  %v468_v50 = vmul.f32 %v886_v45, %v1115_v8 }
  0x69   : > { %797 = vst [vmem:[%s1146_s13 + $0x8] sm:$0xff] %v424_v43  ;;  %v432_v47 = vadd.f32 %v431_v42, %v429_v44  ;;  %v446_v54 = vmul.f32 1015.0, %v424_v43 }
  0x6a   : > { %464 = vst [vmem:[%s1154_s0] sm:$0xff] %v463_v48  ;;  %802 = vst [vmem:[%s1154_s0 + $0x8] sm:$0xff] %v465_v49 }
  0x6b   : > { %v434_v51 = vadd.f32 %v433_v46, %v432_v47  ;;  %803 = vst [vmem:[%s1154_s0 + $0x10] sm:$0xff] %v468_v50 }
  0x6c   : > { %v521_v60 = vld [vmem:[%s1146_s13] sm:$0xff] (%p1230_p7) }
  0x6d   : > { %798 = vst [vmem:[%s1146_s13 + $0x10] sm:$0xff] %v434_v51  ;;  %v440_v52 = vsub.f32 10.0, %v434_v51  ;;  %522 = vst [vmem:[%s489_s25] sm:$0xff] (%p1230_p7), %v521_v60 }
  0x6f   : > { %887 = vrcp.f32 %v440_v52 }
  0x70   : > { %v523_v61 = vld [vmem:[%s1146_s13 + $0x8] sm:$0xff] (%p1230_p7) }
  0x71   : > { %524 = vst [vmem:[%s489_s25 + $0x10] sm:$0xff] (%p1230_p7), %v523_v61 }
  0x74   : > { %v525_v62 = vld [vmem:[%s1146_s13 + $0x10] sm:$0xff] (%p1230_p7) }
  0x75   : > { %526 = vst [vmem:[%s489_s25 + $0x20] sm:$0xff] (%p1230_p7), %v525_v62 }
  0x78   : > { %485 = sbr.rel (!%p1230_p7) target bundleno = 127 (0x7f), region = 116 }
  0x79   : > { %v888_v55 = vpop.eup %887 }
  0x7a   : > { %v443_v56 = vmul.f32 %v888_v55, %v442_v53  ;;  %v447_v57 = vmul.f32 %v888_v55, %v446_v54 }
  0x7c   : > { %v444_v58 = vadd.f32 256.0, %v443_v56  ;;  %v448_v59 = vadd.f32 256.0, %v447_v57 }
  0x7e   : > { %445 = vst [vmem:[%s369_s12] sm:$0xff] %v444_v58  ;;  %799 = vst [vmem:[%s369_s12 + $0x8] sm:$0xff] %v448_v59 }
  0x7f PF: > { %p1231_p9 = scmp.ne.s32.totalorder %s1222_s6, 0 }
  0x80   : > { %s806_s7 = sshll.u32 (%p1231_p9), %s950_s21, 2 }
  0x81   : > { %532 = sbr.rel (!%p1231_p9) target bundleno = 136 (0x88), region = 154  ;;  %s534_s11 = sadd.s32 (%p1231_p9), %s946_s20, %s806_s7 }
  0x82   : > { %s807_s15 = sshll.u32 (%p1231_p9), %s534_s11, 3 }
  0x83   : > { %s536_s1 = scalar_lea.vmem (%p1231_p9), %s1214_s4, %s807_s15 }
  0x85   : > { %v566_v63 = vld [vmem:[%s369_s12] sm:$0xff] (%p1231_p9)  ;;  %v568_v0 = vld [vmem:[%s369_s12 + $0x8] sm:$0xff] (%p1231_p9) }
  0x86   : > { %567 = vst [vmem:[%s536_s1] sm:$0xff] (%p1231_p9), %v566_v63  ;;  %569 = vst [vmem:[%s536_s1 + $0x10] sm:$0xff] (%p1231_p9), %v568_v0 }
  0x88 PF: > { %p1232_p10 = scmp.ne.s32.totalorder %s1222_s6, 0 }
  0x89   : > { %s817_s17 = smul.u32 (%p1232_p10), 6, %s950_s21  ;;  %v611_v1 = vld [vmem:[%s1154_s0] sm:$0xff] (%p1232_p10)  ;;  %v613_v2 = vld [vmem:[%s1154_s0 + $0x8] sm:$0xff] (%p1232_p10)  ;;  %v615_v3 = vld [vmem:[%s1154_s0 + $0x10] sm:$0xff] (%p1232_p10) }
  0x8a   : > { %575 = sbr.rel (!%p1232_p10) target bundleno = 145 (0x91), region = 192 }
  0x8b   : > { %s577_s13 = sadd.s32 (%p1232_p10), %s946_s20, %s817_s17 }
  0x8c   : > { %s808_s2 = sshll.u32 (%p1232_p10), %s577_s13, 3 }
  0x8d   : > { %s579_s29 = scalar_lea.vmem (%p1232_p10), %s1215_s5, %s808_s2 }
  0x8e   : > { %612 = vst [vmem:[%s579_s29] sm:$0xff] (%p1232_p10), %v611_v1  ;;  %614 = vst [vmem:[%s579_s29 + $0x10] sm:$0xff] (%p1232_p10), %v613_v2 }
  0x8f   : > { %616 = vst [vmem:[%s579_s29 + $0x20] sm:$0xff] (%p1232_p10), %v615_v3 }
  0x91 PF: > { %s17_s24 = sadd.s32 1, %s962_s24   ;;  %s1233_s18 = smov %s942_s19 }
  0x92   : > { %p14_p11 = scmp.ge.s32.totalorder %s17_s24, 6   ;;  %s1234_s19 = smov %s1070_s14 }
  0x93   : > { %s1235_s20 = smov %s954_s22  ;;  %s1236_s21 = smov %s958_s23 }
  0x94   : > { %s1237_s22 = smov %s1240_s26  ;;  %s1238_s23 = smov %s1244_s27 }
  0x95   :  { %16 = sbr.rel (!%p14_p11) target bundleno = 8 (0x8), region = 303 }
  0x9c   :  { %646 = vsyncpa [#allocation3], 1 }
  0x9d   :  { %648 = vsyncpa [#allocation3 + $0x1], 1 }

</bundles_post_ra>
